<compile_context>
chip_gen: v7x
topology: tpu7x:2x2x1
jax: 0.10.0
libtpu: 0.0.40
codegen_flags: <defaults>
</compile_context>

<pallas_src>
import jax
import jax.numpy as jnp
from jax import lax
from jax.experimental import pallas as pl
from jax.experimental.pallas import tpu as pltpu


_COMPUTE_CHUNK = 256       # lanes per in-kernel compute chunk (multiple of 128)
_GRID_TARGET_STEPS = 8     # aim for ~8 grid steps (>=4/TensorCore on v7x)


def _round_up(x, m):
    return (x + m - 1) // m * m


def _tpu_budget():
    """(batch_tile cap, vmem_limit_bytes) per TPU generation."""
    try:
        kind = jax.devices()[0].device_kind.lower()
    except Exception:  # pragma: no cover - defensive
        kind = ""
    if "v5" in kind or "v6" in kind:
        # 128 MiB physical VMEM: large tiles, generous scoped limit.
        return 16384, 64 * 1024 * 1024
    # v7x (64 MiB VMEM/TC) or unknown: keep headroom.
    return 8192, 40 * 1024 * 1024


def _mlp_kernel(x_ref, w1_ref, b1_ref, w2_ref, b2_ref, w3_ref, b3_ref, o_ref):
    # Shapes (T = batch tile on the lane axis, C = compute chunk):
    #   x_ref: (2, T)    w1: (50, 2)   b1: (50, 1)
    #   h1   : (50, C)   w2: (50, 50)  b2: (50, 1)
    #   h2   : (50, C)   w3: (2, 50)   b3: (2, 1)
    #   o_ref: (2, T)
    # Weights/biases are VMEM-resident across the whole grid (constant index
    # maps); only the (2, T) input/output blocks stream.
    w1 = w1_ref[...]
    w1a = w1[:, 0:1]
    w1b = w1[:, 1:2]
    b1 = b1_ref[...]
    w2 = w2_ref[...]
    b2 = b2_ref[...]
    w3 = w3_ref[...]
    b3 = b3_ref[...]

    t = x_ref.shape[-1]
    num_chunks = t // _COMPUTE_CHUNK  # wrapper guarantees divisibility

    def body(c, carry):
        start = pl.multiple_of(c * _COMPUTE_CHUNK, _COMPUTE_CHUNK)
        x = x_ref[:, pl.ds(start, _COMPUTE_CHUNK)]                 # (2, C)

        # Layer 1: K=2 contraction as a rank-2 outer-product update on the
        # VPU (the MXU would be ~1% utilized on a K=2 matmul).
        z1 = w1a * x[0:1, :] + w1b * x[1:2, :] + b1                # (50, C)
        h1 = jnp.tanh(z1)

        # Layer 2: the only matmul worth the MXU; C lanes streamed.
        z2 = jnp.dot(w2, h1, preferred_element_type=jnp.float32) + b2
        h2 = jnp.tanh(z2)

        # Layer 3: (2,50) @ (50,C) -> lane-dense output chunk.
        z3 = jnp.dot(w3, h2, preferred_element_type=jnp.float32) + b3
        o_ref[:, pl.ds(start, _COMPUTE_CHUNK)] = z3.astype(o_ref.dtype)
        return carry

    # Short loops fully unrolled for LLO scheduler visibility; partial unroll
    # for very deep chunk counts to keep code size in check.
    unroll = True if num_chunks <= 16 else 8
    lax.fori_loop(0, num_chunks, body, 0, unroll=unroll)


def pinn_forward_2xn(xt, params, *, batch_tile=None):
    """Steady-state entry point: xt is (2, N) (batch on lanes), returns (2, N).

    Keeping collocation points stored in this layout across a training/eval
    loop avoids the (N,2)<->(2,N) relayout copies entirely.
    """
    d_in, n = xt.shape
    assert d_in == 2

    w1, b1 = params["w1"], params["b1"]
    w2, b2 = params["w2"], params["b2"]
    w3, b3 = params["w3"], params["b3"]

    cap, vmem_limit = _tpu_budget()
    if batch_tile is None:
        # Scale the tile with n so large batches get big, HBM-efficient DMAs
        # while keeping enough grid steps to pipeline / shard.
        batch_tile = _round_up(pl.cdiv(n, _GRID_TARGET_STEPS), _COMPUTE_CHUNK)
    batch_tile = max(
        _COMPUTE_CHUNK, min(_round_up(int(batch_tile), _COMPUTE_CHUNK), cap)
    )

    # Remainder handling: pad the batch instead of asserting divisibility.
    n_pad = _round_up(n, batch_tile)
    if n_pad != n:
        xt = jnp.pad(xt, ((0, 0), (0, n_pad - n)))

    # Biases as (out, 1) columns for the column-major compute layout.
    b1c = b1.reshape(-1, 1)
    b2c = b2.reshape(-1, 1)
    b3c = b3.reshape(-1, 1)

    grid = (n_pad // batch_tile,)

    # Weights/biases: full-array blocks with constant index_map -> stay
    # VMEM-resident across all grid steps (~11 KB total).
    def full(a):
        return pl.BlockSpec(a.shape, lambda i: (0, 0))

    out_t = pl.pallas_call(
        _mlp_kernel,
        out_shape=jax.ShapeDtypeStruct((2, n_pad), xt.dtype),
        grid_spec=pltpu.PrefetchScalarGridSpec(
            num_scalar_prefetch=0,
            grid=grid,
            in_specs=[
                pl.BlockSpec((2, batch_tile), lambda i: (0, i)),
                full(w1),
                full(b1c),
                full(w2),
                full(b2c),
                full(w3),
                full(b3c),
            ],
            out_specs=pl.BlockSpec((2, batch_tile), lambda i: (0, i)),
        ),
        compiler_params=pltpu.CompilerParams(
            dimension_semantics=("parallel",),
            vmem_limit_bytes=vmem_limit,
        ),
    )(xt, w1, b1c, w2, b2c, w3, b3c)

    if n_pad != n:
        out_t = out_t[:, :n]
    return out_t


def pinn_forward(x, params, *, batch_tile=None):
    """PyTorch-convention wrapper: x (N, 2) -> (N, 2).

    Pays one relayout each way; for hot loops prefer pinn_forward_2xn.
    """
    n, d_in = x.shape
    assert d_in == 2
    out_t = pinn_forward_2xn(x.T, params, batch_tile=batch_tile)
    return out_t.T


def init_params(key):
    """PyTorch-layout params: nn.Linear(in, out) -> weight (out, in), bias (out,).

    Uniform(-1/sqrt(in), 1/sqrt(in)) like PyTorch's default init (JAX PRNG).
    """
    ks = jax.random.split(key, 6)

    def lin(kw, kb, fan_in, fan_out):
        bound = 1.0 / jnp.sqrt(jnp.float32(fan_in))
        w = jax.random.uniform(kw, (fan_out, fan_in), jnp.float32, -bound, bound)
        b = jax.random.uniform(kb, (fan_out,), jnp.float32, -bound, bound)
        return w, b

    w1, b1 = lin(ks[0], ks[1], 2, 50)
    w2, b2 = lin(ks[2], ks[3], 50, 50)
    w3, b3 = lin(ks[4], ks[5], 50, 2)
    return {"w1": w1, "b1": b1, "w2": w2, "b2": b2, "w3": w3, "b3": b3}


def reference_forward(x, params):
    # Pure-JAX reference in the PyTorch convention: x @ W.T + b.
    h1 = jnp.tanh(x @ params["w1"].T + params["b1"])
    h2 = jnp.tanh(h1 @ params["w2"].T + params["b2"])
    return h2 @ params["w3"].T + params["b3"]


if __name__ == "__main__":
    key = jax.random.PRNGKey(0)
    k_x, k_p = jax.random.split(key)

    # N=1000 is intentionally NOT a multiple of the tile: exercises padding
    # and (with the default tile of 256) a 4-step pipelined grid.
    n = 1000
    x = jax.random.normal(k_x, (n, 2), jnp.float32)
    params = init_params(k_p)
    ref = reference_forward(x, params)

    # Default (n-scaled) tile: 4 grid steps, 1 compute chunk each.
    out = jax.block_until_ready(pinn_forward(x, params))
    assert out.shape == (n, 2)
    assert jnp.allclose(out, ref, atol=1e-5, rtol=1e-5)

    # Larger tile: 1 grid step, 4 in-kernel compute chunks (fori_loop path).
    out_big = jax.block_until_ready(pinn_forward(x, params, batch_tile=1024))
    assert jnp.allclose(out_big, ref, atol=1e-5, rtol=1e-5)

    # Steady-state (2, N) layout path: no wrapper transposes at all.
    out_2xn = jax.block_until_ready(pinn_forward_2xn(x.T, params))
    assert out_2xn.shape == (2, n)
    assert jnp.allclose(out_2xn, ref.T, atol=1e-5, rtol=1e-5)

    print("KERNEL_OK")
</pallas_src>

<mosaic_0001>
module attributes {stable_mosaic.version = 11 : i64} {
  func.func @_mlp_kernel(%arg0: i32, %arg1: memref<2x256xf32, #tpu.memory_space<vmem>>, %arg2: memref<50x2xf32, #tpu.memory_space<vmem>>, %arg3: memref<50x1xf32, #tpu.memory_space<vmem>>, %arg4: memref<50x50xf32, #tpu.memory_space<vmem>>, %arg5: memref<50x1xf32, #tpu.memory_space<vmem>>, %arg6: memref<2x50xf32, #tpu.memory_space<vmem>>, %arg7: memref<2x1xf32, #tpu.memory_space<vmem>>, %arg8: memref<2x256xf32, #tpu.memory_space<vmem>>) attributes {dimension_semantics = [#tpu.dimension_semantics<parallel>], iteration_bounds = array<i64: 4>, scalar_prefetch = 0 : i64, scratch_operands = 0 : i64, tpu.core_type = #tpu.core_type<tc>, window_params = [{transform_indices = @transform_0, window_bounds = array<i64: 2, 256>}, {pipeline_mode = #tpu.pipeline_mode<synchronous>, transform_indices = @transform_1, window_bounds = array<i64: 50, 2>}, {pipeline_mode = #tpu.pipeline_mode<synchronous>, transform_indices = @transform_2, window_bounds = array<i64: 50, 1>}, {pipeline_mode = #tpu.pipeline_mode<synchronous>, transform_indices = @transform_3, window_bounds = array<i64: 50, 50>}, {pipeline_mode = #tpu.pipeline_mode<synchronous>, transform_indices = @transform_4, window_bounds = array<i64: 50, 1>}, {pipeline_mode = #tpu.pipeline_mode<synchronous>, transform_indices = @transform_5, window_bounds = array<i64: 2, 50>}, {pipeline_mode = #tpu.pipeline_mode<synchronous>, transform_indices = @transform_6, window_bounds = array<i64: 2, 1>}, {transform_indices = @transform_7, window_bounds = array<i64: 2, 256>}]} {
    %c0 = arith.constant 0 : index
    %c0_0 = arith.constant 0 : index
    %0 = vector.load %arg2[%c0, %c0_0] : memref<50x2xf32, #tpu.memory_space<vmem>>, vector<50x2xf32>
    %1 = vector.extract_strided_slice %0 {offsets = [0, 0], sizes = [50, 1], strides = [1, 1]} : vector<50x2xf32> to vector<50x1xf32>
    %2 = vector.extract_strided_slice %0 {offsets = [0, 1], sizes = [50, 1], strides = [1, 1]} : vector<50x2xf32> to vector<50x1xf32>
    %c0_1 = arith.constant 0 : index
    %c0_2 = arith.constant 0 : index
    %3 = vector.load %arg3[%c0_1, %c0_2] : memref<50x1xf32, #tpu.memory_space<vmem>>, vector<50x1xf32>
    %c0_3 = arith.constant 0 : index
    %c0_4 = arith.constant 0 : index
    %4 = vector.load %arg4[%c0_3, %c0_4] : memref<50x50xf32, #tpu.memory_space<vmem>>, vector<50x50xf32>
    %c0_5 = arith.constant 0 : index
    %c0_6 = arith.constant 0 : index
    %5 = vector.load %arg5[%c0_5, %c0_6] : memref<50x1xf32, #tpu.memory_space<vmem>>, vector<50x1xf32>
    %c0_7 = arith.constant 0 : index
    %c0_8 = arith.constant 0 : index
    %6 = vector.load %arg6[%c0_7, %c0_8] : memref<2x50xf32, #tpu.memory_space<vmem>>, vector<2x50xf32>
    %c0_9 = arith.constant 0 : index
    %c0_10 = arith.constant 0 : index
    %7 = vector.load %arg7[%c0_9, %c0_10] : memref<2x1xf32, #tpu.memory_space<vmem>>, vector<2x1xf32>
    %c0_i32 = arith.constant 0 : i32
    %c256_i32 = arith.constant 256 : i32
    %8 = arith.muli %c0_i32, %c256_i32 : i32
    %9 = tpu.assume_multiple %8, 256 : i32
    %c0_11 = arith.constant 0 : index
    %10 = arith.index_cast %9 : i32 to index
    %11 = vector.load %arg1[%c0_11, %10] : memref<2x256xf32, #tpu.memory_space<vmem>>, vector<2x256xf32>
    %12 = vector.extract_strided_slice %11 {offsets = [0, 0], sizes = [1, 256], strides = [1, 1]} : vector<2x256xf32> to vector<1x256xf32>
    %13 = vector.broadcast %1 : vector<50x1xf32> to vector<50x256xf32>
    %14 = vector.broadcast %12 : vector<1x256xf32> to vector<50x256xf32>
    %15 = arith.mulf %13, %14 : vector<50x256xf32>
    %16 = vector.extract_strided_slice %11 {offsets = [1, 0], sizes = [1, 256], strides = [1, 1]} : vector<2x256xf32> to vector<1x256xf32>
    %17 = vector.broadcast %2 : vector<50x1xf32> to vector<50x256xf32>
    %18 = vector.broadcast %16 : vector<1x256xf32> to vector<50x256xf32>
    %19 = arith.mulf %17, %18 : vector<50x256xf32>
    %20 = arith.addf %15, %19 : vector<50x256xf32>
    %21 = vector.broadcast %3 : vector<50x1xf32> to vector<50x256xf32>
    %22 = arith.addf %20, %21 : vector<50x256xf32>
    %23 = math.tanh %22 : vector<50x256xf32>
    %cst = arith.constant dense<0.000000e+00> : vector<50x256xf32>
    %24 = tpu.matmul %4, %23, %cst {dimension_numbers = #tpu.dot_dimension_numbers<[1], [0], [0], [1], [0, 0, 1, 1], [], []>} : vector<50x50xf32>, vector<50x256xf32>, vector<50x256xf32> -> vector<50x256xf32>
    %25 = vector.broadcast %5 : vector<50x1xf32> to vector<50x256xf32>
    %26 = arith.addf %24, %25 : vector<50x256xf32>
    %27 = math.tanh %26 : vector<50x256xf32>
    %cst_12 = arith.constant dense<0.000000e+00> : vector<2x256xf32>
    %28 = tpu.matmul %6, %27, %cst_12 {dimension_numbers = #tpu.dot_dimension_numbers<[1], [0], [0], [1], [0, 0, 1, 1], [], []>} : vector<2x50xf32>, vector<50x256xf32>, vector<2x256xf32> -> vector<2x256xf32>
    %29 = vector.broadcast %7 : vector<2x1xf32> to vector<2x256xf32>
    %30 = arith.addf %28, %29 : vector<2x256xf32>
    %c0_13 = arith.constant 0 : index
    %31 = arith.index_cast %9 : i32 to index
    %32 = vector.load %arg8[%c0_13, %31] : memref<2x256xf32, #tpu.memory_space<vmem>>, vector<2x256xf32>
    tpu.vector_store %arg8[%c0_13, %31], %30 {strides = array<i32>} : memref<2x256xf32, #tpu.memory_space<vmem>>, vector<2x256xf32>,
    %c1_i32 = arith.constant 1 : i32
    return
  }
  func.func @transform_0(%arg0: i32) -> (i32, i32) {
    %c0_i32 = arith.constant 0 : i32
    %c0_i32_0 = arith.constant 0 : i32
    return %c0_i32, %arg0 : i32, i32
  }
  func.func @transform_1(%arg0: i32) -> (i32, i32) {
    %c0_i32 = arith.constant 0 : i32
    %c0_i32_0 = arith.constant 0 : i32
    %c0_i32_1 = arith.constant 0 : i32
    return %c0_i32, %c0_i32_0 : i32, i32
  }
  func.func @transform_2(%arg0: i32) -> (i32, i32) {
    %c0_i32 = arith.constant 0 : i32
    %c0_i32_0 = arith.constant 0 : i32
    %c0_i32_1 = arith.constant 0 : i32
    return %c0_i32, %c0_i32_0 : i32, i32
  }
  func.func @transform_3(%arg0: i32) -> (i32, i32) {
    %c0_i32 = arith.constant 0 : i32
    %c0_i32_0 = arith.constant 0 : i32
    %c0_i32_1 = arith.constant 0 : i32
    return %c0_i32, %c0_i32_0 : i32, i32
  }
  func.func @transform_4(%arg0: i32) -> (i32, i32) {
    %c0_i32 = arith.constant 0 : i32
    %c0_i32_0 = arith.constant 0 : i32
    %c0_i32_1 = arith.constant 0 : i32
    return %c0_i32, %c0_i32_0 : i32, i32
  }
  func.func @transform_5(%arg0: i32) -> (i32, i32) {
    %c0_i32 = arith.constant 0 : i32
    %c0_i32_0 = arith.constant 0 : i32
    %c0_i32_1 = arith.constant 0 : i32
    return %c0_i32, %c0_i32_0 : i32, i32
  }
  func.func @transform_6(%arg0: i32) -> (i32, i32) {
    %c0_i32 = arith.constant 0 : i32
    %c0_i32_0 = arith.constant 0 : i32
    %c0_i32_1 = arith.constant 0 : i32
    return %c0_i32, %c0_i32_0 : i32, i32
  }
  func.func @transform_7(%arg0: i32) -> (i32, i32) {
    %c0_i32 = arith.constant 0 : i32
    %c0_i32_0 = arith.constant 0 : i32
    return %c0_i32, %arg0 : i32, i32
  }
}

</mosaic_0001>

<bundles_post_ra>
// kernel: tpu_custom_call.1
= control target key start
LH: loop header
LB: loop body
LE: loop exit
PB: predicated region body
PF: predicated region fallthrough
CT: control target
= control target key end

     0   :  { %12 = vsyncpa [#allocation3], 0  ;;  %s1387_s0 = inlined_call_operand.vmem [shape: f32[2,1024], index: 0, kind: input, shape index: {}]   ;;  %s1388_s1 = inlined_call_operand.vmem [shape: f32[50,2], index: 1, kind: input, shape index: {}]   ;;  %s1389_s2 = inlined_call_operand.vmem [shape: f32[50,1], index: 2, kind: input, shape index: {}]   ;;  %s1390_s3 = inlined_call_operand.vmem [shape: f32[50,50], index: 3, kind: input, shape index: {}]   ;;  %s1391_s4 = inlined_call_operand.vmem [shape: f32[50,1], index: 4, kind: input, shape index: {}]   ;;  %s1392_s5 = inlined_call_operand.vmem [shape: f32[2,50], index: 5, kind: input, shape index: {}]   ;;  %s1393_s6 = inlined_call_operand.vmem [shape: f32[2,1], index: 6, kind: input, shape index: {}]   ;;  %s1394_s7 = inlined_call_operand.hbm [shape: f32[2,1024], index: 7, kind: output, shape index: {}]  }
   0x1   :  { %14 = vsyncpa [#allocation3 + $0x1], 0  ;;  %s1138_s24 = smov 0   ;;  %s1140_s25 = smov 0  }
   0x2   :  { %s1142_s26 = smov 0   ;;  %s1144_s27 = smov 0  }
   0x3 LB: > { %s1159_s28 = sadd.s32 4294967295, %s1092_s27   ;;  %s872_s29 = sadd.s32 4294967294, %s1092_s27   ;;  %s1092_s27 = sphi %s1144_s27, %s1400_s27   ;;  %s1088_s26 = sphi %s1142_s26, %s1399_s26   ;;  %s1084_s25 = sphi %s1140_s25, %s1398_s25   ;;  %s1080_s24 = sphi %s1138_s24, %s1397_s24  }
   0x4   : > { %s1163_s30 = sadd.s32 1, %s1092_s27   ;;  %s179_s8 = sadd.s32 1, %s1088_s26 }
   0x5   : > { %s176_s9 = ssub.s32 %s1092_s27, %s1163_s30  ;;  %p189_p0 = scmp.ne.s32.totalorder %s1088_s26, %s1084_s25 }
   0x6   : > { %p177_p1 = scmp.eq.s32.totalorder %s176_s9, 0  ;;  %p190_p2 = scmp.eq.s32.totalorder %s1159_s28, 3 }
   0x7   : > { %p195_p3 = scmp.ne.s32.totalorder %s1084_s25, %s1080_s24  ;;  %p196_p4 = scmp.eq.s32.totalorder %s872_s29, 3 }
   0x8   : > { %s1174_s10 = scalar_select %p177_p1, %s1088_s26, %s179_s8  }
   0x9   : > { %p1176_p5 = por %p190_p2, %p189_p0  ;;  %p1180_p6 = por %p196_p4, %p195_p3 }
   0xa   : > { %p875_p7 = scmp.ge.s32.totalorder %s1092_s27, 1  ;;  %p241_p8 = scmp.lt.s32.totalorder %s1092_s27, 5 }
   0xc   : > { %p242_p9 = pnand %p875_p7, %p241_p8 }
   0xd   : > { %v282_v0 = vld [vmem:[%s1388_s1 + $0x10] sm:$0xff] (!%p242_p9)  ;;  %v280_v1 = vld [vmem:[%s1388_s1] sm:$0xff] (!%p242_p9)  ;;  %v1094_v2 = vmov (!%p242_p9), 1   ;;  %v281_v4 = vld [vmem:[%s1388_s1 + $0x8] sm:$0xff] (!%p242_p9)  ;;  %v1095_v6 = vmov (!%p242_p9), 0   ;;  %v1096_v20 = vmov (!%p242_p9), 0.0   ;;  %v347_v25 = vlaneseq (!%p242_p9) }
   0xe   : > { %245 = sbr.rel (%p242_p9) target bundleno = 698 (0x2ba), region = 48  ;;  %966 = vset.pattern.permute.xlu0 (!%p242_p9), %v1094_v2  ;;  %964 = vset.pattern.permute.xlu1 (!%p242_p9), %v1094_v2  ;;  %v284_v3 = vld [vmem:[%s1388_s1 + $0x20] sm:$0xff] (!%p242_p9)  ;;  %v283_v5 = vld [vmem:[%s1388_s1 + $0x18] sm:$0xff] (!%p242_p9)  ;;  %v288_v8 = vld [vmem:[%s1389_s2 + $0x8] sm:$0xff] (!%p242_p9)  ;;  %s877_s15 = sshll.u32 (!%p242_p9), %s1159_s28, 1  ;;  %vm573_vm0 = vcmask (!%p242_p9), 1041408  }
   0xf   : > { %388 = vperm.xlu0 (!%p242_p9), %966, %v282_v0   ;;  %380 = vperm.xlu1 (!%p242_p9), %964, %v280_v1   ;;  %v287_v7 = vld [vmem:[%s1389_s2] sm:$0xff] (!%p242_p9)  ;;  %v290_v9 = vld [vmem:[%s1389_s2 + $0x18] sm:$0xff] (!%p242_p9)  ;;  %v285_v10 = vld [vmem:[%s1388_s1 + $0x28] sm:$0xff] (!%p242_p9)  ;;  %p274_p10 = scmp.lt.s32.totalorder (!%p242_p9), %s877_s15, 7  ;;  %v348_v26 = vshrl.u32 (!%p242_p9), %v347_v25, 7  ;;  %vm551_vm1 = vcmask (!%p242_p9), 408576  }
  0x10   : > { %v286_v11 = vld [vmem:[%s1388_s1 + $0x30] sm:$0x3] (!%p242_p9)  ;;  %v302_v13 = vld [vmem:[%s1391_s4 + $0x8] sm:$0xff] (!%p242_p9)  ;;  %v304_v15 = vld [vmem:[%s1391_s4 + $0x18] sm:$0xff] (!%p242_p9)  ;;  %644 = vmatprep.mubr.f32.mxu0 (!%p242_p9), %v1096_v20  ;;  %779 = vmatprep.mubr.f32.mxu1 (!%p242_p9), %v1096_v20  ;;  %s270_s22 = sand.u32 (!%p242_p9), 1, %s1084_s25   ;;  %s897_s29 = sshll.u32 (!%p242_p9), %s1159_s28, 6 }
  0x11   : > { %v293_v12 = vld [vmem:[%s1389_s2 + $0x30] sm:$0x3] (!%p242_p9)  ;;  %v291_v16 = vld [vmem:[%s1389_s2 + $0x20] sm:$0xff] (!%p242_p9)  ;;  %v306_v17 = vld [vmem:[%s1391_s4 + $0x28] sm:$0xff] (!%p242_p9)  ;;  %v349_v29 = vsub.s32 (!%p242_p9), 0, %v348_v26  ;;  %v353_v30 = vsub.s32 (!%p242_p9), 2, %v348_v26 }
  0x12   : > { %v289_v14 = vld [vmem:[%s1389_s2 + $0x10] sm:$0xff] (!%p242_p9)  ;;  %v292_v18 = vld [vmem:[%s1389_s2 + $0x28] sm:$0xff] (!%p242_p9)  ;;  %v309_v19 = vld [vmem:[%s1393_s6] sm:$0x3] (!%p242_p9)  ;;  %v409_v31 = vsub.s32 (!%p242_p9), 1, %v348_v26  ;;  %v413_v32 = vsub.s32 (!%p242_p9), 3, %v348_v26 }
  0x13   : > { %396 = vperm.xlu0 (!%p242_p9), %966, %v284_v3   ;;  %384 = vperm.xlu1 (!%p242_p9), %964, %v281_v4   ;;  %v301_v21 = vld [vmem:[%s1391_s4] sm:$0xff] (!%p242_p9)  ;;  %v303_v22 = vld [vmem:[%s1391_s4 + $0x10] sm:$0xff] (!%p242_p9)  ;;  %s876_s23 = sshll.u32 (!%p242_p9), %s270_s22, 2  ;;  %s1097_s28 = smov (!%p242_p9), [#allocation2]  }
  0x14   : > { %v305_v23 = vld [vmem:[%s1391_s4 + $0x20] sm:$0xff] (!%p242_p9)  ;;  %v307_v24 = vld [vmem:[%s1391_s4 + $0x30] sm:$0x3] (!%p242_p9)  ;;  %s272_s8 = scalar_lea.vmem (!%p242_p9), [#allocation2], %s876_s23  ;;  %s1034_s18 = sshll.u32 (!%p242_p9), %s1097_s28, 4  ;;  %s1035_s18 = int_to_ptr.vmem [resolvable:$false] %s1034_s18 }
  0x15   : > { %s1402_s15 = smov (!%p274_p10, %s877_s15), 7  ;;  %s813_s9 = sshll.u32 %s272_s8, 4  ;;  %s1347_s9 = int_to_ptr.vmem [resolvable:$true] %s813_s9 }
  0x16   : > { %s878_s16 = sshll.u32 %s1402_s15, 1  ;;  %s1345_s15 = scalar_lea.hbm %s1394_s7, %s897_s29 }
  0x17   : > { %969 = vset.pattern.permute.xlu0 %v1095_v6  ;;  %965 = vset.pattern.permute.xlu1 %v1095_v6  ;;  %s277_s19 = scalar_lea.vmem %s1387_s0, %s878_s16  ;;  %s799_s16 = scalar_lea.sflag [#allocation3], %s270_s22 }
  0x18   : > { %313 = vperm.xlu0 %969, %v280_v1   ;;  %328 = vperm.xlu1 %965, %v283_v5   ;;  %v310_v35 = vld [vmem:[%s277_s19] sm:$0xf]  ;;  %s1030_s17 = scalar_lea.vmem %s1347_s9, 64  ;;  %s1036_s19 = scalar_lea.vmem %s1035_s18, 128 }
  0x19   : > { %v350_v36 = vrot.slane %v310_v35, %v349_v29  ;;  %v354_v37 = vrot.slane %v310_v35, %v353_v30  ;;  %v410_v38 = vrot.slane %v310_v35, %v409_v31  ;;  %v414_v39 = vrot.slane %v310_v35, %v413_v32  ;;  %p1031_p11 = scmp.ne.s32.totalorder %s1347_s9, %s1030_s17  ;;  %p1037_p0 = scmp.lt.s32.totalorder %s1347_s9, %s1035_s18 }
  0x1a   : > { %p1038_p1 = scmp.lt.s32.totalorder %s1036_s19, %s1030_s17 }
  0x1b   : > { %v1260_v42 = vrot.slane %v350_v36, %v349_v29  ;;  %v1262_v43 = vrot.slane %v354_v37, %v349_v29  ;;  %v1264_v44 = vrot.slane %v410_v38, %v409_v31  ;;  %v1266_v45 = vrot.slane %v414_v39, %v409_v31  ;;  %p1032_p12 = pnand %p1031_p11, %p1176_p5 }
  0x1c   : > { %318 = vperm.xlu0 %969, %v281_v4   ;;  %967 = vset.pattern.permute.xlu1 %v1094_v2  ;;  %p1039_p2 = por %p1038_p1, %p1037_p0 }
  0x1d   : > { %392 = vperm.xlu1 %967, %v283_v5   ;;  %p1033_p13 = pneg %p1032_p12 }
  0x1f   : > { %p1040_p3 = pnand %p1039_p2, %p1033_p13 }
  0x20   : > { %323 = vperm.xlu0 %969, %v282_v0  }
  0x21   : > { %968 = vset.pattern.permute.xlu1 %v1095_v6 }
  0x22   : > { %455 = vperm.xlu1 %968, %v287_v7  }
  0x24   : > { %460 = vperm.xlu0 %969, %v288_v8  }
  0x26   : > { %333 = vperm.xlu1 %968, %v284_v3  }
  0x28   : > { %470 = vperm.xlu0 %969, %v290_v9  }
  0x2a   : > { %338 = vperm.xlu1 %968, %v285_v10  }
  0x2c   : > { %343 = vperm.xlu0 %969, %v286_v11  }
  0x2e   : > { %970 = vset.pattern.permute.xlu1 %v1094_v2 }
  0x2f   : > { %400 = vperm.xlu1 %970, %v285_v10  }
  0x30   : > { %485 = vperm.xlu0 %969, %v293_v12  }
  0x33   : > { %971 = vset.pattern.permute.xlu1 %v1095_v6 }
  0x34   : > { %523 = vperm.xlu0 %969, %v302_v13   ;;  %465 = vperm.xlu1 %971, %v289_v14  }
  0x38   : > { %533 = vperm.xlu0 %969, %v304_v15   ;;  %475 = vperm.xlu1 %971, %v291_v16  }
  0x3c   : > { %543 = vperm.xlu0 %969, %v306_v17   ;;  %480 = vperm.xlu1 %971, %v292_v18  }
  0x40   : > { %703 = vperm.xlu0 %969, %v309_v19   ;;  %972 = vset.pattern.permute.xlu1 %v1094_v2 }
  0x41   : > { %404 = vperm.xlu1 %972, %v286_v11  }
  0x45   : > { %973 = vset.pattern.permute.xlu1 %v1095_v6 }
  0x46   : > { %518 = vperm.xlu1 %973, %v301_v21  }
  0x4a   : > { %528 = vperm.xlu1 %973, %v303_v22  }
  0x4e   : > { %538 = vperm.xlu1 %973, %v305_v23  }
  0x52   : > { %548 = vperm.xlu1 %973, %v307_v24  }
  0x8e   : > { %v381_v27 = vpop.permute.xlu1 %380  ;;  %v389_v28 = vpop.permute.xlu0 %388 }
  0x8f   : > { %v425_v50 = vmul.f32 %v1264_v44, %v381_v27  ;;  %v426_v51 = vmul.f32 %v1266_v45, %v381_v27  ;;  %v429_v8 = vmul.f32 %v1264_v44, %v389_v28  ;;  %v430_v12 = vmul.f32 %v1266_v45, %v389_v28 }
  0x92   : > { %v385_v33 = vpop.permute.xlu1 %384  ;;  %v1258_v34 = vpop.permute.xlu0 %396 }
  0x93   : > { %v427_v55 = vmul.f32 %v1264_v44, %v385_v33  ;;  %v428_v56 = vmul.f32 %v1266_v45, %v385_v33  ;;  %v433_v31 = vmul.f32 %v1264_v44, %v1258_v34  ;;  %v434_v35 = vmul.f32 %v1266_v45, %v1258_v34 }
  0x97   : > { %v314_v40 = vpop.permute.xlu0 %313  ;;  %v329_v41 = vpop.permute.xlu1 %328 }
  0x98   : > { %v365_v47 = vmul.f32 %v1260_v42, %v314_v40  ;;  %v366_v48 = vmul.f32 %v1262_v43, %v314_v40  ;;  %v371_v7 = vmul.f32 %v1260_v42, %v329_v41  ;;  %v372_v9 = vmul.f32 %v1262_v43, %v329_v41 }
  0x9a   : > { %v439_v57 = vadd.f32 %v425_v50, %v365_v47  ;;  %v440_v58 = vadd.f32 %v426_v51, %v366_v48 }
  0x9b   : > { %v319_v46 = vpop.permute.xlu0 %318 }
  0x9c   : > { %v393_v49 = vpop.permute.xlu1 %392  ;;  %v367_v52 = vmul.f32 %v1260_v42, %v319_v46  ;;  %v368_v53 = vmul.f32 %v1262_v43, %v319_v46 }
  0x9d   : > { %v431_v5 = vmul.f32 %v1264_v44, %v393_v49  ;;  %v432_v6 = vmul.f32 %v1266_v45, %v393_v49 }
  0x9e   : > { %v441_v62 = vadd.f32 %v427_v55, %v367_v52  ;;  %v442_v63 = vadd.f32 %v428_v56, %v368_v53 }
  0x9f   : > { %v324_v54 = vpop.permute.xlu0 %323  ;;  %v445_v15 = vadd.f32 %v431_v5, %v371_v7  ;;  %v446_v18 = vadd.f32 %v432_v6, %v372_v9 }
  0xa0   : > { %v369_v13 = vmul.f32 %v1260_v42, %v324_v54  ;;  %v370_v14 = vmul.f32 %v1262_v43, %v324_v54 }
  0xa1   : > { %v456_v59 = vpop.permute.xlu1 %455 }
  0xa2   : > { %v488_v60 = vadd.f32 %v456_v59, %v439_v57  ;;  %v489_v61 = vadd.f32 %v456_v59, %v440_v58  ;;  %v443_v26 = vadd.f32 %v429_v8, %v369_v13  ;;  %v444_v27 = vadd.f32 %v430_v12, %v370_v14  ;;  %v296_v12 = vld [vmem:[%s1390_s3 + $0x10] sm:$0xff]  ;;  %v297_v13 = vld [vmem:[%s1390_s3 + $0x18] sm:$0xff]  ;;  %v298_v14 = vld [vmem:[%s1390_s3 + $0x20] sm:$0xff] }
  0xa3   : > { %v461_v0 = vpop.permute.xlu0 %460 }
  0xa4   : > { %974 = vtanh.f32 %v488_v60  ;;  %v490_v1 = vadd.f32 %v461_v0, %v441_v62  ;;  %v491_v2 = vadd.f32 %v461_v0, %v442_v63 }
  0xa5   : > { %976 = vtanh.f32 %v489_v61  ;;  %v334_v3 = vpop.permute.xlu1 %333 }
  0xa6   : > { %978 = vtanh.f32 %v490_v1  ;;  %v373_v25 = vmul.f32 %v1260_v42, %v334_v3  ;;  %v374_v28 = vmul.f32 %v1262_v43, %v334_v3 }
  0xa7   : > { %980 = vtanh.f32 %v491_v2  ;;  %v471_v10 = vpop.permute.xlu0 %470 }
  0xa8   : > { %v494_v21 = vadd.f32 %v471_v10, %v445_v15  ;;  %v495_v23 = vadd.f32 %v471_v10, %v446_v18  ;;  %v447_v38 = vadd.f32 %v433_v31, %v373_v25  ;;  %v448_v40 = vadd.f32 %v434_v35, %v374_v28  ;;  %v294_v10 = vld [vmem:[%s1390_s3] sm:$0xff]  ;;  %v299_v15 = vld [vmem:[%s1390_s3 + $0x28] sm:$0xff] }
  0xa9   : > { %v339_v4 = vpop.permute.xlu1 %338 }
  0xaa   : > { %982 = vtanh.f32 %v494_v21  ;;  %v375_v41 = vmul.f32 %v1260_v42, %v339_v4  ;;  %v376_v46 = vmul.f32 %v1262_v43, %v339_v4 }
  0xab   : > { %984 = vtanh.f32 %v495_v23  ;;  %v344_v53 = vpop.permute.xlu0 %343 }
  0xac   : > { %v377_v57 = vmul.f32 %v1260_v42, %v344_v53  ;;  %v378_v60 = vmul.f32 %v1262_v43, %v344_v53 }
  0xae   : > { %v975_v11 = vpop.eup %974  ;;  %v401_v16 = vpop.permute.xlu1 %400 }
  0xaf   : > { %v977_v17 = vpop.eup %976  ;;  %v435_v36 = vmul.f32 %v1264_v44, %v401_v16  ;;  %v436_v37 = vmul.f32 %v1266_v45, %v401_v16  ;;  %v486_v3 = vpop.permute.xlu0 %485  ;;  %v300_v16 = vld [vmem:[%s1390_s3 + $0x30] sm:$0x3] }
  0xb0   : > { %v979_v19 = vpop.eup %978 }
  0xb1   : > { %v981_v22 = vpop.eup %980  ;;  %v900_v24 = vpack.c.bf16 %v979_v19, %v975_v11  ;;  %v449_v49 = vadd.f32 %v435_v36, %v375_v41  ;;  %v450_v50 = vadd.f32 %v436_v37, %v376_v46  ;;  %v295_v11 = vld [vmem:[%s1390_s3 + $0x8] sm:$0xff] }
  0xb2   : > { %v898_v29 = vpack.c.bf16 %v981_v22, %v977_v17 }
  0xb3   : > { %v466_v30 = vpop.permute.xlu1 %465  ;;  %v524_v23 = vpop.permute.xlu0 %523 }
  0xb4   : > { %v492_v32 = vadd.f32 %v466_v30, %v443_v26  ;;  %v493_v33 = vadd.f32 %v466_v30, %v444_v27  ;;  %899 = vmatprep.subr.bf16.mxu0 %v898_v29  ;;  %v983_v54 = vpop.eup %982 }
  0xb5   : > { %901 = vmatpush1.bf16.msra.mxu0 %v900_v24  ;;  %v985_v55 = vpop.eup %984 }
  0xb6   : > { %986 = vtanh.f32 %v492_v32 }
  0xb7   : > { %988 = vtanh.f32 %v493_v33  ;;  %v476_v39 = vpop.permute.xlu1 %475  ;;  %v534_v32 = vpop.permute.xlu0 %533 }
  0xb8   : > { %v496_v47 = vadd.f32 %v476_v39, %v447_v38  ;;  %v497_v48 = vadd.f32 %v476_v39, %v448_v40 }
  0xba   : > { %990 = vtanh.f32 %v496_v47 }
  0xbb   : > { %v481_v34 = vpop.permute.xlu1 %480  ;;  %992 = vtanh.f32 %v497_v48 }
  0xbc   : > { %v498_v51 = vadd.f32 %v481_v34, %v449_v49  ;;  %v499_v52 = vadd.f32 %v481_v34, %v450_v50 }
  0xbe   : > { %994 = vtanh.f32 %v498_v51 }
  0xbf   : > { %996 = vtanh.f32 %v499_v52  ;;  %v544_v52 = vpop.permute.xlu0 %543 }
  0xc0   : > { %v987_v56 = vpop.eup %986  ;;  %v405_v58 = vpop.permute.xlu1 %404 }
  0xc1   : > { %v989_v59 = vpop.eup %988  ;;  %v437_v61 = vmul.f32 %v1264_v44, %v405_v58  ;;  %v438_v62 = vmul.f32 %v1266_v45, %v405_v58  ;;  %v904_v63 = vpack.c.bf16 %v983_v54, %v987_v56 }
  0xc2   : > { %v902_v0 = vpack.c.bf16 %v985_v55, %v989_v59 }
  0xc3   : > { %v451_v1 = vadd.f32 %v437_v61, %v377_v57  ;;  %v452_v2 = vadd.f32 %v438_v62, %v378_v60 }
  0xc4   : > { %903 = vmatprep.subr.bf16.mxu0 %v902_v0  ;;  %v991_v6 = vpop.eup %990 }
  0xc5   : > { %v500_v4 = vadd.f32 %v486_v3, %v451_v1  ;;  %v501_v5 = vadd.f32 %v486_v3, %v452_v2  ;;  %905 = vmatpush1.bf16.msra.mxu0 %v904_v63  ;;  %v993_v7 = vpop.eup %992  ;;  %v519_v17 = vpop.permute.xlu1 %518 }
  0xc7   : > { %998 = vtanh.f32 %v500_v4 }
  0xc8   : > { %v995_v42 = vpop.eup %994  ;;  %1000 = vtanh.f32 %v501_v5 }
  0xc9   : > { %v997_v8 = vpop.eup %996  ;;  %v908_v43 = vpack.c.bf16 %v995_v42, %v991_v6 }
  0xca   : > { %v906_v9 = vpack.c.bf16 %v997_v8, %v993_v7 }
  0xcc   : > { %907 = vmatprep.subr.bf16.mxu0 %v906_v9  ;;  %v308_v9 = vld [vmem:[%s1392_s5] sm:$0x3] }
  0xcd   : > { %909 = vmatpush1.bf16.msra.mxu0 %v908_v43 }
  0xd1   : > { %v999_v44 = vpop.eup %998 }
  0xd2   : > { %v1001_v45 = vpop.eup %1000 }
  0xd3   : > { %879 = vmatprep.subr.msk.mxu0 %vm573_vm0, %v1001_v45  ;;  %v704_v45 = vpop.permute.xlu0 %703 }
  0xd4   : > { %880 = vmatpush1.msk.msra.mxu0 %vm573_vm0, %v999_v44 }
  0xd5   : > { %881 = vmatmul.mubr.msk.f32.vlgmr.msra.gmra.mrb[0].mxu0 %vm551_vm1, %v294_v10 }
  0xd6   : > { %650 = vmatprep.mubr.f32.mxu0 %v1096_v20 }
  0xd9   : > { %882 = vmatmul.mubr.msk.f32.gmra.mrb[2].mxu0 %vm551_vm1, %v295_v11 }
  0xda   : > { %656 = vmatprep.mubr.f32.mxu0 %v1096_v20 }
  0xdd   : > { %883 = vmatmul.mubr.msk.f32.gmra.mrb[4].mxu0 %vm551_vm1, %v296_v12 }
  0xde   : > { %662 = vmatprep.mubr.f32.mxu0 %v1096_v20 }
  0xe1   : > { %884 = vmatmul.mubr.msk.f32.gmra.mrb[6].mxu0 %vm551_vm1, %v297_v13 }
  0xe2   : > { %668 = vmatprep.mubr.f32.mxu0 %v1096_v20 }
  0xe5   : > { %885 = vmatmul.mubr.msk.f32.gmra.mrb[8].mxu0 %vm551_vm1, %v298_v14 }
  0xe6   : > { %674 = vmatprep.mubr.f32.mxu0 %v1096_v20 }
  0xe9   : > { %886 = vmatmul.mubr.msk.f32.gmra.mrb[10].mxu0 %vm551_vm1, %v299_v15 }
  0xea   : > { %680 = vmatprep.mubr.f32.mxu0 %v1096_v20  ;;  %v529_v20 = vpop.permute.xlu1 %528 }
  0xed   : > { %887 = vmatmul.mubr.msk.f32.gmra.mrb[12].mxu0 %vm551_vm1, %v300_v16 }
  0xee   : > { %v539_v40 = vpop.permute.xlu1 %538 }
  0xf2   : > { %v549_v61 = vpop.permute.xlu1 %548 }
 0x1a8   : > { %v646_v18 = vpop.f32.mrb[0].mxu0 }
 0x1a9   : > { %v647_v19 = vadd.f32 %v646_v18, %v519_v17  ;;  %v648_v21 = vpop.f32.mrb[1].mxu0 }
 0x1aa   : > { %v649_v22 = vadd.f32 %v648_v21, %v519_v17 }
 0x1ab   : > { %1002 = vtanh.f32 %v647_v19 }
 0x1ac   : > { %v652_v24 = vpop.f32.mrb[2].mxu0  ;;  %1004 = vtanh.f32 %v649_v22 }
 0x1ad   : > { %v653_v25 = vadd.f32 %v652_v24, %v524_v23  ;;  %v654_v26 = vpop.f32.mrb[3].mxu0 }
 0x1ae   : > { %v655_v27 = vadd.f32 %v654_v26, %v524_v23 }
 0x1af   : > { %1006 = vtanh.f32 %v653_v25 }
 0x1b0   : > { %1008 = vtanh.f32 %v655_v27  ;;  %v658_v29 = vpop.f32.mrb[4].mxu0 }
 0x1b1   : > { %v659_v28 = vadd.f32 %v658_v29, %v529_v20  ;;  %v660_v30 = vpop.f32.mrb[5].mxu0 }
 0x1b2   : > { %v661_v31 = vadd.f32 %v660_v30, %v529_v20 }
 0x1b3   : > { %1010 = vtanh.f32 %v659_v28 }
 0x1b4   : > { %v664_v33 = vpop.f32.mrb[6].mxu0  ;;  %1012 = vtanh.f32 %v661_v31 }
 0x1b5   : > { %v665_v35 = vadd.f32 %v664_v33, %v534_v32  ;;  %v666_v36 = vpop.f32.mrb[7].mxu0  ;;  %v1003_v38 = vpop.eup %1002 }
 0x1b6   : > { %v667_v37 = vadd.f32 %v666_v36, %v534_v32  ;;  %v1005_v39 = vpop.eup %1004 }
 0x1b7   : > { %1014 = vtanh.f32 %v665_v35 }
 0x1b8   : > { %1016 = vtanh.f32 %v667_v37  ;;  %v670_v41 = vpop.f32.mrb[8].mxu0 }
 0x1b9   : > { %v1007_v46 = vpop.eup %1006  ;;  %v671_v47 = vadd.f32 %v670_v41, %v539_v40  ;;  %v672_v48 = vpop.f32.mrb[9].mxu0 }
 0x1ba   : > { %v1009_v49 = vpop.eup %1008  ;;  %v673_v50 = vadd.f32 %v672_v48, %v539_v40  ;;  %v912_v34 = vpack.c.bf16 %v1007_v46, %v1003_v38 }
 0x1bb   : > { %v910_v51 = vpack.c.bf16 %v1009_v49, %v1005_v39  ;;  %1018 = vtanh.f32 %v671_v47 }
 0x1bc   : > { %v676_v53 = vpop.f32.mrb[10].mxu0  ;;  %1020 = vtanh.f32 %v673_v50 }
 0x1bd   : > { %v677_v54 = vadd.f32 %v676_v53, %v544_v52  ;;  %v678_v55 = vpop.f32.mrb[11].mxu0  ;;  %911 = vmatprep.subr.bf16.mxu1 %v910_v51  ;;  %v1011_v57 = vpop.eup %1010 }
 0x1be   : > { %v679_v56 = vadd.f32 %v678_v55, %v544_v52  ;;  %913 = vmatpush1.bf16.msra.mxu1 %v912_v34  ;;  %v1013_v58 = vpop.eup %1012 }
 0x1bf   : > { %1022 = vtanh.f32 %v677_v54 }
 0x1c0   : > { %1024 = vtanh.f32 %v679_v56  ;;  %v682_v59 = vpop.f32.mrb[12].mxu0 }
 0x1c1   : > { %v1015_v60 = vpop.eup %1014  ;;  %v684_v62 = vpop.f32.mrb[13].mxu0  ;;  %v683_v2 = vadd.f32 %v682_v59, %v549_v61 }
 0x1c2   : > { %v1017_v63 = vpop.eup %1016  ;;  %v685_v0 = vadd.f32 %v684_v62, %v549_v61  ;;  %v916_v1 = vpack.c.bf16 %v1015_v60, %v1011_v57 }
 0x1c3   : > { %v914_v3 = vpack.c.bf16 %v1017_v63, %v1013_v58 }
 0x1c4   : > { %1026 = vtanh.f32 %v685_v0 }
 0x1c5   : > { %915 = vmatprep.subr.bf16.mxu1 %v914_v3  ;;  %v1019_v4 = vpop.eup %1018  ;;  %1028 = vtanh.f32 %v683_v2 }
 0x1c6   : > { %917 = vmatpush1.bf16.msra.mxu1 %v916_v1  ;;  %v1021_v5 = vpop.eup %1020 }
 0x1c9   : > { %v1023_v6 = vpop.eup %1022 }
 0x1ca   : > { %v1025_v7 = vpop.eup %1024  ;;  %v920_v42 = vpack.c.bf16 %v1023_v6, %v1019_v4 }
 0x1cb   : > { %v918_v8 = vpack.c.bf16 %v1025_v7, %v1021_v5 }
 0x1cd   : > { %919 = vmatprep.subr.bf16.mxu1 %v918_v8 }
 0x1ce   : > { %v1027_v43 = vpop.eup %1026  ;;  %921 = vmatpush1.bf16.msra.mxu1 %v920_v42 }
 0x1cf   : > { %888 = vmatprep.subr.msk.mxu1 %vm573_vm0, %v1027_v43  ;;  %v1029_v44 = vpop.eup %1028 }
 0x1d2   : > { %889 = vmatpush1.msk.msra.mxu1 %vm573_vm0, %v1029_v44 }
 0x1d3   : > { %890 = vmatmul.mubr.msk.f32.vlgmr.msra.gmra.mrb[0].mxu1 %vm551_vm1, %v308_v9 }
 0x2a6   : > { %v781_v10 = vpop.f32.mrb[0].mxu1 }
 0x2a7   : > { %v782_v11 = vadd.f32 %v781_v10, %v704_v45  ;;  %v783_v12 = vpop.f32.mrb[1].mxu1 }
 0x2a8   : > { %v784_v13 = vadd.f32 %v783_v12, %v704_v45 }
 0x2aa   : > { %v788_v14 = vcombine.low %v782_v11, %v784_v13 }
 0x2ac   : > { %891 = vst.sshfl [vmem:[%s272_s8] sm:$0x33 pattern:$0x76325410] %v788_v14 }
 0x2ad   : > { %1043 = shalt.err (!%p1040_p3)
}
 0x2ae   : > { %s1044_s20 = scalar_lea.hbm %s1345_s15, 64  ;;  %s1048_s23 = scalar_lea.hbm %s1394_s7, 256 }
 0x2af   : > { %p1045_p4 = scmp.ne.s32.totalorder %s1345_s15, %s1044_s20  ;;  %p1049_p9 = scmp.lt.u32.totalorder %s1345_s15, %s1394_s7 }
 0x2b0   : > { %p1050_p10 = scmp.lt.u32.totalorder %s1048_s23, %s1044_s20  ;;  %p1052_p12 = scmp.lt.u32.totalorder %s1044_s20, %s1345_s15 }
 0x2b1   : > { %p1046_p7 = pnand %p1045_p4, %p1176_p5 }
 0x2b2   : > { %p1051_p11 = por %p1050_p10, %p1049_p9 }
 0x2b3   : > { %p1047_p8 = pneg %p1046_p7 }
 0x2b4   : > { %p1053_p13 = por %p1052_p12, %p1051_p11 }
 0x2b6   : > { %p1054_p0 = pnand %p1053_p13, %p1047_p8 }
 0x2b8   : > { %1057 = shalt.err (!%p1054_p0)
}
 0x2b9   : > { %922 = dma.vmem_to_hbm [thread:$0]  (%p1176_p5), %s1347_s9, 64, %s1345_s15, %s799_s16  }
 0x2ba PF: > { %p928_p1 = scmp.ge.s32.totalorder %s1092_s27, 2  ;;  %s825_s13 = sand.u32 1, %s1080_s24  }
 0x2bb   : > { %s826_s14 = scalar_lea.sflag [#allocation3], %s825_s13 }
 0x2bc   : > { %p925_p2 = pnand %p928_p1, %p1180_p6 }
 0x2be   : > { %1075 = dma.done.wait (!%p925_p2), %s826_s14, 64  }
 0x2bf   : > { %1077 = vsyncadd (!%p925_p2), %s826_s14, 4294967232  ;;  %p17_p3 = scmp.ge.s32.totalorder %s1163_s30, 6   ;;  %s1397_s24 = smov %s1084_s25 }
 0x2c0   : > { %s1398_s25 = smov %s1088_s26  ;;  %s1399_s26 = smov %s1174_s10 }
 0x2c1   : > { %s1400_s27 = smov %s1163_s30  ;;  %19 = sbr.rel (!%p17_p3) target bundleno = 3 (0x3), region = 83 }
 0x2c8   :  { %831 = vsyncpa [#allocation3], 1 }
 0x2c9   :  { %833 = vsyncpa [#allocation3 + $0x1], 1 }

</bundles_post_ra>
